<compile_context>
chip_gen: v5e
topology: v5e:2x2
jax: 0.10.0
libtpu: 0.0.40
codegen_flags: <defaults>
</compile_context>

<pallas_src>
import functools

import jax
import jax.numpy as jnp
import numpy as np
from jax.experimental import pallas as pl
from jax.experimental.pallas import tpu as pltpu


# ----------------------------------------------------------------------------
# Pallas kernel: the whole TwoStageFusion forward for one output stream
# (all batch elements at once).
# ----------------------------------------------------------------------------
def _two_stage_fusion_kernel(x_ref, w_ref, b_ref, o_ref, *, N, H, W, C):
    """rb1 -> (+ other stream's input) -> rb2 for one output stream.

    x_ref : (2, N, H, W*C) f32   both streams' original inputs (resident block)
    w_ref : (1, 4, 3*W*C, W*C) bf16  banded conv weights (BN scale pre-folded)
    b_ref : (1, 4, W*C) f32      folded BN bias per conv layer
    o_ref : (1, N, H, W*C) f32
    """
    WC = W * C
    R = N * H
    s = pl.program_id(0)

    x0 = x_ref[s].reshape(R, WC)            # this stream's input      (f32)
    xc = x_ref[1 - s].reshape(R, WC)        # other stream's input     (f32)
    bias = b_ref[0]                         # (4, WC) f32

    # Row-within-image index; masks zero the vertical taps that would otherwise
    # wrap across image (or batch-element) boundaries after the roll.
    row = jax.lax.broadcasted_iota(jnp.int32, (N, H, WC), 1).reshape(R, WC)
    not_top = row != 0
    not_bot = row != (H - 1)

    def conv3x3_bn(a, layer, relu, res=None):
        """3x3 conv (pad=1, bias=False) + folded BN + optional residual + ReLU.

        Vertical taps come from sublane rolls (+1 and +R-1 == -1) masked at the
        per-image borders; horizontal taps, channel mixing and left/right zero
        padding are folded into the banded weight matrix, so the whole conv is
        one (R, 3*WC) @ (3*WC, WC) MXU matmul with f32 accumulation.
        """
        up = jnp.where(not_top, pltpu.roll(a, shift=1, axis=0), 0.0)
        dn = jnp.where(not_bot, pltpu.roll(a, shift=R - 1, axis=0), 0.0)
        xcat = jnp.concatenate(
            [up.astype(jnp.bfloat16), a.astype(jnp.bfloat16),
             dn.astype(jnp.bfloat16)], axis=1)                     # (R, 3*WC)
        y = jnp.dot(xcat, w_ref[0, layer],
                    preferred_element_type=jnp.float32)            # (R, WC) f32
        y = y + bias[layer:layer + 1]
        if res is not None:
            y = y + res
        if relu:
            y = jnp.maximum(y, 0.0)
        return y

    def residual_block(a, base):
        h = conv3x3_bn(a, base + 0, relu=True)
        return conv3x3_bn(h, base + 1, relu=True, res=a)

    fb = residual_block(x0, 0)        # stage-1 block of this stream
    out = residual_block(fb + xc, 2)  # fused cross-stream add + stage-2 block
    o_ref[0] = out.reshape(N, H, WC).astype(o_ref.dtype)


# ----------------------------------------------------------------------------
# Host-side parameter lowering
# ----------------------------------------------------------------------------
def _conv_w_to_band(w, W):
    """(3,3,Cin,Cout) HWIO 3x3 weights -> (3*W*Cin, W*Cout) banded matrix.

    band[dy*W*C + xin*C + ci, xout*C + co] = w[dy, xin - xout + 1, ci, co]
    (zero when |xin - xout| > 1), so that for lane-dense rows with zeroed
    out-of-image vertical taps:
        out[y] = concat(x[y-1], x[y], x[y+1]) @ band
    reproduces a stride-1, padding=1 conv.
    """
    C = w.shape[2]
    xin = jnp.arange(W)[:, None]
    xout = jnp.arange(W)[None, :]
    dx = xin - xout + 1                                   # horizontal tap index
    valid = (dx >= 0) & (dx <= 2)
    g = w[:, jnp.clip(dx, 0, 2)]                          # (3, W, W, Cin, Cout)
    g = jnp.where(valid[None, :, :, None, None], g, 0.0)
    band = jnp.transpose(g, (0, 1, 3, 2, 4))              # (3, W, Cin, W, Cout)
    return band.reshape(3 * W * C, W * C)


def _prepare_fused_params(params, W, wdtype=jnp.bfloat16):
    """Per-output-stream banded weights (BN scale folded in) and BN biases."""
    streams = (("rb1_rgb", "rb2_rgb"), ("rb1_depth", "rb2_depth"))
    wbands, biases = [], []
    for blk1, blk2 in streams:
        layers = [(params[blk1]["w1"], params[blk1]["s1"], params[blk1]["b1"]),
                  (params[blk1]["w2"], params[blk1]["s2"], params[blk1]["b2"]),
                  (params[blk2]["w1"], params[blk2]["s1"], params[blk2]["b1"]),
                  (params[blk2]["w2"], params[blk2]["s2"], params[blk2]["b2"])]
        wb, bb = [], []
        for (w, scale, bias) in layers:
            band = _conv_w_to_band(w, W) * jnp.tile(scale, W)[None, :]  # fold BN scale
            wb.append(band)
            bb.append(jnp.tile(bias, W))
        wbands.append(jnp.stack(wb))
        biases.append(jnp.stack(bb))
    return (jnp.stack(wbands).astype(wdtype),        # (2, 4, 3*W*C, W*C)
            jnp.stack(biases).astype(jnp.float32))   # (2, 4, W*C)


# ----------------------------------------------------------------------------
# Public wrapper (PyTorch-style NCHW in, NCHW out)
# ----------------------------------------------------------------------------
def two_stage_fusion(x_rgb_nchw, x_depth_nchw, params):
    N, C, H, W = x_rgb_nchw.shape
    WC = W * C
    R = N * H

    def to_lane_dense(x):   # NCHW -> (N, H, W*C), channels fastest on the lane axis
        return jnp.transpose(x, (0, 2, 3, 1)).astype(jnp.float32).reshape(N, H, WC)

    x_all = jnp.stack([to_lane_dense(x_rgb_nchw), to_lane_dense(x_depth_nchw)])
    wbands, biases = _prepare_fused_params(params, W)

    kern = functools.partial(_two_stage_fusion_kernel, N=N, H=H, W=W, C=C)
    flops = 2 * 4 * 2 * R * (3 * WC) * WC
    bytes_accessed = (2 * x_all.size * 4          # input block read by each stream
                      + wbands.size * 2
                      + biases.size * 4
                      + 2 * R * WC * 4)           # outputs

    out = pl.pallas_call(
        kern,
        out_shape=jax.ShapeDtypeStruct((2, N, H, WC), jnp.float32),
        grid=(2,),                                              # output stream
        in_specs=[
            pl.BlockSpec((2, N, H, WC), lambda s: (0, 0, 0, 0)),       # both inputs
            pl.BlockSpec((1, 4, 3 * WC, WC), lambda s: (s, 0, 0, 0)),  # banded weights
            pl.BlockSpec((1, 4, WC), lambda s: (s, 0, 0)),             # BN bias
        ],
        out_specs=pl.BlockSpec((1, N, H, WC), lambda s: (s, 0, 0, 0)),
        compiler_params=pltpu.CompilerParams(
            dimension_semantics=("parallel",)),
        cost_estimate=pl.CostEstimate(flops=flops, transcendentals=0,
                                      bytes_accessed=bytes_accessed),
    )(x_all, wbands, biases)

    out = out.reshape(2, N, H, W, C)
    out_nhwc = jnp.concatenate([out[0], out[1]], axis=-1)     # channel concat
    return jnp.transpose(out_nhwc, (0, 3, 1, 2))              # back to NCHW


# ----------------------------------------------------------------------------
# Deterministic parameter construction (synthetic; no checkpoint load)
# ----------------------------------------------------------------------------
def make_block_params(key, C, eps=1e-5):
    ks = jax.random.split(key, 10)

    def bn_fold(kg, kb, km, kv):
        gamma = 1.0 + 0.1 * jax.random.normal(kg, (C,), jnp.float32)
        beta = 0.1 * jax.random.normal(kb, (C,), jnp.float32)
        mean = 0.1 * jax.random.normal(km, (C,), jnp.float32)
        var = jax.random.uniform(kv, (C,), jnp.float32, 0.5, 1.5)
        scale = gamma / jnp.sqrt(var + eps)
        bias = beta - mean * scale
        return scale, bias

    w1 = 0.1 * jax.random.normal(ks[0], (3, 3, C, C), jnp.float32)
    w2 = 0.1 * jax.random.normal(ks[1], (3, 3, C, C), jnp.float32)
    s1, b1 = bn_fold(ks[2], ks[3], ks[4], ks[5])
    s2, b2 = bn_fold(ks[6], ks[7], ks[8], ks[9])
    return {"w1": w1, "s1": s1, "b1": b1, "w2": w2, "s2": s2, "b2": b2}


# ----------------------------------------------------------------------------
# Pure-JAX reference (for correctness check)
# ----------------------------------------------------------------------------
def _ref_conv_bn(x, w, scale, bias, residual, relu):
    y = jax.lax.conv_general_dilated(
        x, w, window_strides=(1, 1), padding="SAME",
        dimension_numbers=("NHWC", "HWIO", "NHWC"),
        precision=jax.lax.Precision.HIGHEST)
    y = y * scale + bias
    if residual is not None:
        y = y + residual
    return jnp.maximum(y, 0.0) if relu else y


def _ref_block(x, p):
    h = _ref_conv_bn(x, p["w1"], p["s1"], p["b1"], None, True)
    return _ref_conv_bn(h, p["w2"], p["s2"], p["b2"], x, True)


def _ref_fusion(x_rgb_nchw, x_depth_nchw, params):
    x_rgb = jnp.transpose(x_rgb_nchw, (0, 2, 3, 1)).astype(jnp.float32)
    x_dpt = jnp.transpose(x_depth_nchw, (0, 2, 3, 1)).astype(jnp.float32)
    fbc = _ref_block(x_rgb, params["rb1_rgb"])
    fbd = _ref_block(x_dpt, params["rb1_depth"])
    out_rgb = _ref_block(fbc + x_dpt, params["rb2_rgb"])
    out_dpt = _ref_block(fbd + x_rgb, params["rb2_depth"])
    out = jnp.concatenate([out_rgb, out_dpt], axis=-1)
    return jnp.transpose(out, (0, 3, 1, 2))


# ----------------------------------------------------------------------------
if __name__ == "__main__":
    N, C, H, W = 2, 8, 16, 16          # W*C = 128 -> fully lane-dense layout
    key = jax.random.PRNGKey(0)
    k_rgb, k_dpt, k_p = jax.random.split(key, 3)

    x_rgb = jax.random.normal(k_rgb, (N, C, H, W), jnp.float32)    # NCHW
    x_depth = jax.random.normal(k_dpt, (N, C, H, W), jnp.float32)  # NCHW

    pkeys = jax.random.split(k_p, 4)
    params = {
        "rb1_rgb": make_block_params(pkeys[0], C),
        "rb1_depth": make_block_params(pkeys[1], C),
        "rb2_rgb": make_block_params(pkeys[2], C),
        "rb2_depth": make_block_params(pkeys[3], C),
    }

    fused = jax.jit(two_stage_fusion)
    out = jax.block_until_ready(fused(x_rgb, x_depth, params))
    assert out.shape == (N, 2 * C, H, W), out.shape

    ref = jax.block_until_ready(_ref_fusion(x_rgb, x_depth, params))
    # Kernel feeds bf16 into the MXU (f32 accumulation) with BN scale folded into
    # the bf16 weights; reference is full-f32 (Precision.HIGHEST), so compare with
    # a bf16-appropriate tolerance.
    np.testing.assert_allclose(np.asarray(out), np.asarray(ref),
                               rtol=5e-2, atol=5e-2)
    print("KERNEL_OK")
</pallas_src>

<mosaic_0001>
module attributes {stable_mosaic.version = 11 : i64} {
  func.func @_two_stage_fusion_kernel(%arg0: i32, %arg1: memref<2x2x16x128xf32, #tpu.memory_space<vmem>>, %arg2: memref<1x4x384x128xbf16, #tpu.memory_space<vmem>>, %arg3: memref<1x4x128xf32, #tpu.memory_space<vmem>>, %arg4: memref<1x2x16x128xf32, #tpu.memory_space<vmem>>) attributes {dimension_semantics = [#tpu.dimension_semantics<parallel>], iteration_bounds = array<i64: 2>, scalar_prefetch = 0 : i64, scratch_operands = 0 : i64, tpu.core_type = #tpu.core_type<tc>, window_params = [{pipeline_mode = #tpu.pipeline_mode<synchronous>, transform_indices = @transform_0, window_bounds = array<i64: 2, 2, 16, 128>}, {transform_indices = @transform_1, window_bounds = array<i64: 1, 4, 384, 128>}, {transform_indices = @transform_2, window_bounds = array<i64: 1, 4, 128>}, {transform_indices = @transform_3, window_bounds = array<i64: 1, 2, 16, 128>}]} {
    %0 = arith.index_cast %arg0 : i32 to index
    %c0 = arith.constant 0 : index
    %c0_0 = arith.constant 0 : index
    %c0_1 = arith.constant 0 : index
    %1 = vector.load %arg1[%0, %c0, %c0_0, %c0_1] : memref<2x2x16x128xf32, #tpu.memory_space<vmem>>, vector<1x2x16x128xf32>
    %2 = vector.shape_cast %1 : vector<1x2x16x128xf32> to vector<2x16x128xf32>
    %3 = vector.shape_cast %2 : vector<2x16x128xf32> to vector<32x128xf32>
    %c1_i32 = arith.constant 1 : i32
    %4 = arith.subi %c1_i32, %arg0 : i32
    %5 = arith.index_cast %4 : i32 to index
    %c0_2 = arith.constant 0 : index
    %c0_3 = arith.constant 0 : index
    %c0_4 = arith.constant 0 : index
    %6 = vector.load %arg1[%5, %c0_2, %c0_3, %c0_4] : memref<2x2x16x128xf32, #tpu.memory_space<vmem>>, vector<1x2x16x128xf32>
    %7 = vector.shape_cast %6 : vector<1x2x16x128xf32> to vector<2x16x128xf32>
    %8 = vector.shape_cast %7 : vector<2x16x128xf32> to vector<32x128xf32>
    %c0_5 = arith.constant 0 : index
    %c0_6 = arith.constant 0 : index
    %c0_7 = arith.constant 0 : index
    %9 = vector.load %arg3[%c0_5, %c0_6, %c0_7] : memref<1x4x128xf32, #tpu.memory_space<vmem>>, vector<1x4x128xf32>
    %10 = vector.shape_cast %9 : vector<1x4x128xf32> to vector<4x128xf32>
    %11 = tpu.iota {dimensions = array<i32: 1>} : vector<2x16x128xi32>
    %12 = vector.shape_cast %11 : vector<2x16x128xi32> to vector<32x128xi32>
    %c0_i32 = arith.constant 0 : i32
    %13 = vector.broadcast %c0_i32 : i32 to vector<32x128xi32>
    %14 = arith.cmpi ne, %12, %13 : vector<32x128xi32>
    %c15_i32 = arith.constant 15 : i32
    %15 = vector.broadcast %c15_i32 : i32 to vector<32x128xi32>
    %16 = arith.cmpi ne, %12, %15 : vector<32x128xi32>
    %c1_i32_8 = arith.constant 1 : i32
    %17 = tpu.dynamic_rotate %3 by %c1_i32_8 dim 0 : vector<32x128xf32>, i32 -> vector<32x128xf32>
    %cst = arith.constant 0.000000e+00 : f32
    %18 = vector.broadcast %cst : f32 to vector<32x128xf32>
    %19 = arith.select %14, %17, %18 : vector<32x128xi1>, vector<32x128xf32>
    %c31_i32 = arith.constant 31 : i32
    %20 = tpu.dynamic_rotate %3 by %c31_i32 dim 0 : vector<32x128xf32>, i32 -> vector<32x128xf32>
    %cst_9 = arith.constant 0.000000e+00 : f32
    %21 = vector.broadcast %cst_9 : f32 to vector<32x128xf32>
    %22 = arith.select %16, %20, %21 : vector<32x128xi1>, vector<32x128xf32>
    %23 = arith.truncf %19 : vector<32x128xf32> to vector<32x128xbf16>
    %24 = arith.truncf %3 : vector<32x128xf32> to vector<32x128xbf16>
    %25 = arith.truncf %22 : vector<32x128xf32> to vector<32x128xbf16>
    %26 = tpu.concatenate %23, %24, %25 in 1 : vector<32x128xbf16>, vector<32x128xbf16>, vector<32x128xbf16> -> vector<32x384xbf16>
    %c0_10 = arith.constant 0 : index
    %c0_11 = arith.constant 0 : index
    %c0_12 = arith.constant 0 : index
    %c0_13 = arith.constant 0 : index
    %27 = vector.load %arg2[%c0_10, %c0_11, %c0_12, %c0_13] : memref<1x4x384x128xbf16, #tpu.memory_space<vmem>>, vector<1x1x384x128xbf16>
    %28 = vector.shape_cast %27 : vector<1x1x384x128xbf16> to vector<384x128xbf16>
    %cst_14 = arith.constant dense<0.000000e+00> : vector<32x128xf32>
    %29 = tpu.matmul %26, %28, %cst_14 {dimension_numbers = #tpu.dot_dimension_numbers<[1], [0], [0], [1], [0, 0, 1, 1], [], []>} : vector<32x384xbf16>, vector<384x128xbf16>, vector<32x128xf32> -> vector<32x128xf32>
    %30 = vector.extract_strided_slice %10 {offsets = [0, 0], sizes = [1, 128], strides = [1, 1]} : vector<4x128xf32> to vector<1x128xf32>
    %31 = vector.broadcast %30 : vector<1x128xf32> to vector<32x128xf32>
    %32 = arith.addf %29, %31 : vector<32x128xf32>
    %cst_15 = arith.constant 0.000000e+00 : f32
    %33 = vector.broadcast %cst_15 : f32 to vector<32x128xf32>
    %34 = arith.maximumf %32, %33 : vector<32x128xf32>
    %c1_i32_16 = arith.constant 1 : i32
    %35 = tpu.dynamic_rotate %34 by %c1_i32_16 dim 0 : vector<32x128xf32>, i32 -> vector<32x128xf32>
    %cst_17 = arith.constant 0.000000e+00 : f32
    %36 = vector.broadcast %cst_17 : f32 to vector<32x128xf32>
    %37 = arith.select %14, %35, %36 : vector<32x128xi1>, vector<32x128xf32>
    %c31_i32_18 = arith.constant 31 : i32
    %38 = tpu.dynamic_rotate %34 by %c31_i32_18 dim 0 : vector<32x128xf32>, i32 -> vector<32x128xf32>
    %cst_19 = arith.constant 0.000000e+00 : f32
    %39 = vector.broadcast %cst_19 : f32 to vector<32x128xf32>
    %40 = arith.select %16, %38, %39 : vector<32x128xi1>, vector<32x128xf32>
    %41 = arith.truncf %37 : vector<32x128xf32> to vector<32x128xbf16>
    %42 = arith.truncf %34 : vector<32x128xf32> to vector<32x128xbf16>
    %43 = arith.truncf %40 : vector<32x128xf32> to vector<32x128xbf16>
    %44 = tpu.concatenate %41, %42, %43 in 1 : vector<32x128xbf16>, vector<32x128xbf16>, vector<32x128xbf16> -> vector<32x384xbf16>
    %c0_20 = arith.constant 0 : index
    %c1 = arith.constant 1 : index
    %c0_21 = arith.constant 0 : index
    %c0_22 = arith.constant 0 : index
    %45 = vector.load %arg2[%c0_20, %c1, %c0_21, %c0_22] : memref<1x4x384x128xbf16, #tpu.memory_space<vmem>>, vector<1x1x384x128xbf16>
    %46 = vector.shape_cast %45 : vector<1x1x384x128xbf16> to vector<384x128xbf16>
    %cst_23 = arith.constant dense<0.000000e+00> : vector<32x128xf32>
    %47 = tpu.matmul %44, %46, %cst_23 {dimension_numbers = #tpu.dot_dimension_numbers<[1], [0], [0], [1], [0, 0, 1, 1], [], []>} : vector<32x384xbf16>, vector<384x128xbf16>, vector<32x128xf32> -> vector<32x128xf32>
    %48 = vector.extract_strided_slice %10 {offsets = [1, 0], sizes = [1, 128], strides = [1, 1]} : vector<4x128xf32> to vector<1x128xf32>
    %49 = vector.broadcast %48 : vector<1x128xf32> to vector<32x128xf32>
    %50 = arith.addf %47, %49 : vector<32x128xf32>
    %51 = arith.addf %50, %3 : vector<32x128xf32>
    %cst_24 = arith.constant 0.000000e+00 : f32
    %52 = vector.broadcast %cst_24 : f32 to vector<32x128xf32>
    %53 = arith.maximumf %51, %52 : vector<32x128xf32>
    %54 = arith.addf %53, %8 : vector<32x128xf32>
    %c1_i32_25 = arith.constant 1 : i32
    %55 = tpu.dynamic_rotate %54 by %c1_i32_25 dim 0 : vector<32x128xf32>, i32 -> vector<32x128xf32>
    %cst_26 = arith.constant 0.000000e+00 : f32
    %56 = vector.broadcast %cst_26 : f32 to vector<32x128xf32>
    %57 = arith.select %14, %55, %56 : vector<32x128xi1>, vector<32x128xf32>
    %c31_i32_27 = arith.constant 31 : i32
    %58 = tpu.dynamic_rotate %54 by %c31_i32_27 dim 0 : vector<32x128xf32>, i32 -> vector<32x128xf32>
    %cst_28 = arith.constant 0.000000e+00 : f32
    %59 = vector.broadcast %cst_28 : f32 to vector<32x128xf32>
    %60 = arith.select %16, %58, %59 : vector<32x128xi1>, vector<32x128xf32>
    %61 = arith.truncf %57 : vector<32x128xf32> to vector<32x128xbf16>
    %62 = arith.truncf %54 : vector<32x128xf32> to vector<32x128xbf16>
    %63 = arith.truncf %60 : vector<32x128xf32> to vector<32x128xbf16>
    %64 = tpu.concatenate %61, %62, %63 in 1 : vector<32x128xbf16>, vector<32x128xbf16>, vector<32x128xbf16> -> vector<32x384xbf16>
    %c0_29 = arith.constant 0 : index
    %c2 = arith.constant 2 : index
    %c0_30 = arith.constant 0 : index
    %c0_31 = arith.constant 0 : index
    %65 = vector.load %arg2[%c0_29, %c2, %c0_30, %c0_31] : memref<1x4x384x128xbf16, #tpu.memory_space<vmem>>, vector<1x1x384x128xbf16>
    %66 = vector.shape_cast %65 : vector<1x1x384x128xbf16> to vector<384x128xbf16>
    %cst_32 = arith.constant dense<0.000000e+00> : vector<32x128xf32>
    %67 = tpu.matmul %64, %66, %cst_32 {dimension_numbers = #tpu.dot_dimension_numbers<[1], [0], [0], [1], [0, 0, 1, 1], [], []>} : vector<32x384xbf16>, vector<384x128xbf16>, vector<32x128xf32> -> vector<32x128xf32>
    %68 = vector.extract_strided_slice %10 {offsets = [2, 0], sizes = [1, 128], strides = [1, 1]} : vector<4x128xf32> to vector<1x128xf32>
    %69 = vector.broadcast %68 : vector<1x128xf32> to vector<32x128xf32>
    %70 = arith.addf %67, %69 : vector<32x128xf32>
    %cst_33 = arith.constant 0.000000e+00 : f32
    %71 = vector.broadcast %cst_33 : f32 to vector<32x128xf32>
    %72 = arith.maximumf %70, %71 : vector<32x128xf32>
    %c1_i32_34 = arith.constant 1 : i32
    %73 = tpu.dynamic_rotate %72 by %c1_i32_34 dim 0 : vector<32x128xf32>, i32 -> vector<32x128xf32>
    %cst_35 = arith.constant 0.000000e+00 : f32
    %74 = vector.broadcast %cst_35 : f32 to vector<32x128xf32>
    %75 = arith.select %14, %73, %74 : vector<32x128xi1>, vector<32x128xf32>
    %c31_i32_36 = arith.constant 31 : i32
    %76 = tpu.dynamic_rotate %72 by %c31_i32_36 dim 0 : vector<32x128xf32>, i32 -> vector<32x128xf32>
    %cst_37 = arith.constant 0.000000e+00 : f32
    %77 = vector.broadcast %cst_37 : f32 to vector<32x128xf32>
    %78 = arith.select %16, %76, %77 : vector<32x128xi1>, vector<32x128xf32>
    %79 = arith.truncf %75 : vector<32x128xf32> to vector<32x128xbf16>
    %80 = arith.truncf %72 : vector<32x128xf32> to vector<32x128xbf16>
    %81 = arith.truncf %78 : vector<32x128xf32> to vector<32x128xbf16>
    %82 = tpu.concatenate %79, %80, %81 in 1 : vector<32x128xbf16>, vector<32x128xbf16>, vector<32x128xbf16> -> vector<32x384xbf16>
    %c0_38 = arith.constant 0 : index
    %c3 = arith.constant 3 : index
    %c0_39 = arith.constant 0 : index
    %c0_40 = arith.constant 0 : index
    %83 = vector.load %arg2[%c0_38, %c3, %c0_39, %c0_40] : memref<1x4x384x128xbf16, #tpu.memory_space<vmem>>, vector<1x1x384x128xbf16>
    %84 = vector.shape_cast %83 : vector<1x1x384x128xbf16> to vector<384x128xbf16>
    %cst_41 = arith.constant dense<0.000000e+00> : vector<32x128xf32>
    %85 = tpu.matmul %82, %84, %cst_41 {dimension_numbers = #tpu.dot_dimension_numbers<[1], [0], [0], [1], [0, 0, 1, 1], [], []>} : vector<32x384xbf16>, vector<384x128xbf16>, vector<32x128xf32> -> vector<32x128xf32>
    %86 = vector.extract_strided_slice %10 {offsets = [3, 0], sizes = [1, 128], strides = [1, 1]} : vector<4x128xf32> to vector<1x128xf32>
    %87 = vector.broadcast %86 : vector<1x128xf32> to vector<32x128xf32>
    %88 = arith.addf %85, %87 : vector<32x128xf32>
    %89 = arith.addf %88, %54 : vector<32x128xf32>
    %cst_42 = arith.constant 0.000000e+00 : f32
    %90 = vector.broadcast %cst_42 : f32 to vector<32x128xf32>
    %91 = arith.maximumf %89, %90 : vector<32x128xf32>
    %92 = vector.shape_cast %91 : vector<32x128xf32> to vector<2x16x128xf32>
    %c0_43 = arith.constant 0 : index
    %c0_44 = arith.constant 0 : index
    %c0_45 = arith.constant 0 : index
    %c0_46 = arith.constant 0 : index
    %93 = vector.load %arg4[%c0_43, %c0_44, %c0_45, %c0_46] : memref<1x2x16x128xf32, #tpu.memory_space<vmem>>, vector<1x2x16x128xf32>
    %94 = vector.shape_cast %93 : vector<1x2x16x128xf32> to vector<2x16x128xf32>
    %95 = vector.shape_cast %92 : vector<2x16x128xf32> to vector<1x2x16x128xf32>
    tpu.vector_store %arg4[%c0_43, %c0_44, %c0_45, %c0_46], %95 {strides = array<i32>} : memref<1x2x16x128xf32, #tpu.memory_space<vmem>>, vector<1x2x16x128xf32>,
    return
  }
  func.func @transform_0(%arg0: i32) -> (i32, i32, i32, i32) {
    %c0_i32 = arith.constant 0 : i32
    %c0_i32_0 = arith.constant 0 : i32
    %c0_i32_1 = arith.constant 0 : i32
    %c0_i32_2 = arith.constant 0 : i32
    %c0_i32_3 = arith.constant 0 : i32
    return %c0_i32, %c0_i32_0, %c0_i32_1, %c0_i32_2 : i32, i32, i32, i32
  }
  func.func @transform_1(%arg0: i32) -> (i32, i32, i32, i32) {
    %c0_i32 = arith.constant 0 : i32
    %c0_i32_0 = arith.constant 0 : i32
    %c0_i32_1 = arith.constant 0 : i32
    %c0_i32_2 = arith.constant 0 : i32
    return %arg0, %c0_i32, %c0_i32_0, %c0_i32_1 : i32, i32, i32, i32
  }
  func.func @transform_2(%arg0: i32) -> (i32, i32, i32) {
    %c0_i32 = arith.constant 0 : i32
    %c0_i32_0 = arith.constant 0 : i32
    %c0_i32_1 = arith.constant 0 : i32
    return %arg0, %c0_i32, %c0_i32_0 : i32, i32, i32
  }
  func.func @transform_3(%arg0: i32) -> (i32, i32, i32, i32) {
    %c0_i32 = arith.constant 0 : i32
    %c0_i32_0 = arith.constant 0 : i32
    %c0_i32_1 = arith.constant 0 : i32
    %c0_i32_2 = arith.constant 0 : i32
    return %arg0, %c0_i32, %c0_i32_0, %c0_i32_1 : i32, i32, i32, i32
  }
}

</mosaic_0001>

<bundles_post_ra>
// kernel: tile.110
= control target key start
LH: loop header
LB: loop body
LE: loop exit
PB: predicated region body
PF: predicated region fallthrough
CT: control target
= control target key end

     0   :  { %s28_s0 = inlined_call_operand.vmem [shape: f32[8], index: 0, kind: input, shape index: {}]   ;;  %s29_s1 = inlined_call_operand.vmem [shape: f32[16,8], index: 1, kind: output, shape index: {}]  }
   0x1   :  { %v4_v0 = vld [vmem:[%s28_s0] ss:$0 sm:$0xff] }
   0x2   :  { %5 = vst [vmem:[%s29_s1] sm:$0xff] %v4_v0 }
   0x3   :  { %8 = vst [vmem:[%s29_s1 + $0x8] sm:$0xff] %v4_v0 }

// kernel: tile.116
= control target key start
LH: loop header
LB: loop body
LE: loop exit
PB: predicated region body
PF: predicated region fallthrough
CT: control target
= control target key end

     0   :  { %s131_s10 = smov 120   ;;  %s132_s11 = smov 104   ;;  %vm3_vm0 = vcmask 64512   ;;  %vm9_vm1 = vcmask 1048512   ;;  %vm15_vm2 = vcmask 982912   ;;  %vm21_vm3 = vcmask 917312   ;;  %s207_s0 = inlined_call_operand.vmem [shape: f32[16,8], index: 0, kind: input, shape index: {}]   ;;  %s208_s1 = inlined_call_operand.vmem [shape: f32[1,128], index: 1, kind: output, shape index: {}]  }
   0x1   :  { %v101_v0 = vld [vmem:[%s207_s0 + $0xf] sm:$0x1]   ;;  %v103_v1 = vld [vmem:[%s207_s0 + $0xd] sm:$0x1]   ;;  %v105_v2 = vld [vmem:[%s207_s0 + $0xb] sm:$0x1]  }
   0x2   :  { %7 = vrot.lane.b32.xlu0 %v101_v0, %s131_s10  ;;  %19 = vrot.lane.b32.xlu1 %v103_v1, %s132_s11  ;;  %s133_s14 = smov 88   ;;  %v102_v3 = vld [vmem:[%s207_s0 + $0xe] sm:$0x1]   ;;  %v104_v4 = vld [vmem:[%s207_s0 + $0xc] sm:$0x1]   ;;  %s134_s19 = smov 112  }
   0x3   :  { %31 = vrot.lane.b32.xlu2 %v105_v2, %s133_s14  ;;  %s135_s20 = smov 96   ;;  %v106_v5 = vld [vmem:[%s207_s0 + $0xa] sm:$0x1]   ;;  %s136_s23 = smov 80   ;;  %v107_v6 = vld [vmem:[%s207_s0 + $0x9] sm:$0x1]  }
   0x4   :  { %v108_v7 = vld [vmem:[%s207_s0 + $0x8] sm:$0x1]   ;;  %s137_s28 = smov 72   ;;  %s138_s29 = smov 64   ;;  %v109_v8 = vld [vmem:[%s207_s0 + $0x7] sm:$0x1]  }
   0x5   :  { %s139_s3 = smov 56   ;;  %v110_v9 = vld [vmem:[%s207_s0 + $0x6] sm:$0x1]   ;;  %v111_v10 = vld [vmem:[%s207_s0 + $0x5] sm:$0x1]   ;;  %s140_s8 = smov 48  }
   0x6   :  { %s141_s9 = smov 40   ;;  %v112_v11 = vld [vmem:[%s207_s0 + $0x4] sm:$0x1]   ;;  %s142_s12 = smov 32   ;;  %v113_v12 = vld [vmem:[%s207_s0 + $0x3] sm:$0x1]  }
   0x7   :  { %v114_v13 = vld [vmem:[%s207_s0 + $0x2] sm:$0x1]   ;;  %s143_s17 = smov 24   ;;  %s144_s18 = smov 16   ;;  %v115_v14 = vld [vmem:[%s207_s0 + $0x1] sm:$0x1]  }
   0x8   :  { %s145_s21 = smov 8   ;;  %v2_v15 = vld [vmem:[%s207_s0] sm:$0x1]   ;;  %vm27_vm4 = vcmask 851712   ;;  %vm33_vm5 = vcmask 786112   ;;  %vm39_vm6 = vcmask 720512  }
   0x9   :  { %4 = vst.msk [vmem:[#allocation0] sm:$0x1] %vm3_vm0, %v2_v15   ;;  %vm45_vm7 = vcmask 654912   ;;  %vm51_vm8 = vcmask 589312   ;;  %vm57_vm9 = vcmask 523712   ;;  %vm63_vm10 = vcmask 458112  }
   0xa   :  { %13 = vrot.lane.b32.xlu0 %v102_v3, %s134_s19  ;;  %25 = vrot.lane.b32.xlu1 %v104_v4, %s135_s20  ;;  %vm69_vm11 = vcmask 392512   ;;  %vm75_vm12 = vcmask 326912   ;;  %vm81_vm13 = vcmask 261312   ;;  %vm87_vm14 = vcmask 195712  }
   0xb   :  { %37 = vrot.lane.b32.xlu2 %v106_v5, %s136_s23  ;;  %vm93_vm15 = vcmask 130112  }
  0x12   :  { %43 = vrot.lane.b32.xlu0 %v107_v6, %s137_s28  ;;  %49 = vrot.lane.b32.xlu1 %v108_v7, %s138_s29 }
  0x13   :  { %55 = vrot.lane.b32.xlu2 %v109_v8, %s139_s3 }
  0x1a   :  { %61 = vrot.lane.b32.xlu0 %v110_v9, %s140_s8  ;;  %67 = vrot.lane.b32.xlu1 %v111_v10, %s141_s9 }
  0x1b   :  { %73 = vrot.lane.b32.xlu2 %v112_v11, %s142_s12 }
  0x22   :  { %79 = vrot.lane.b32.xlu0 %v113_v12, %s143_s17  ;;  %85 = vrot.lane.b32.xlu1 %v114_v13, %s144_s18 }
  0x23   :  { %91 = vrot.lane.b32.xlu2 %v115_v14, %s145_s21 }
  0x5d   :  { %v32_v16 = vpop.permute.xlu2 %31  }
  0x65   :  { %v38_v17 = vpop.permute.xlu2 %37  }
  0x6d   :  { %v56_v18 = vpop.permute.xlu2 %55  }
  0x74   :  { %v8_v19 = vpop.permute.xlu0 %7   ;;  %v20_v20 = vpop.permute.xlu1 %19  }
  0x75   :  { %10 = vst.msk [vmem:[#allocation0] sm:$0x1] %vm9_vm1, %v8_v19   ;;  %v74_v21 = vpop.permute.xlu2 %73  }
  0x7c   :  { %v14_v22 = vpop.permute.xlu0 %13   ;;  %v26_v23 = vpop.permute.xlu1 %25  }
  0x7d   :  { %16 = vst.msk [vmem:[#allocation0] sm:$0x1] %vm15_vm2, %v14_v22   ;;  %v92_v24 = vpop.permute.xlu2 %91  }
  0x7e   :  { %22 = vst.msk [vmem:[#allocation0] sm:$0x1] %vm21_vm3, %v20_v20  }
  0x7f   :  { %28 = vst.msk [vmem:[#allocation0] sm:$0x1] %vm27_vm4, %v26_v23  }
  0x80   :  { %34 = vst.msk [vmem:[#allocation0] sm:$0x1] %vm33_vm5, %v32_v16  }
  0x81   :  { %40 = vst.msk [vmem:[#allocation0] sm:$0x1] %vm39_vm6, %v38_v17  }
  0x84   :  { %v44_v25 = vpop.permute.xlu0 %43   ;;  %v50_v26 = vpop.permute.xlu1 %49  }
  0x85   :  { %46 = vst.msk [vmem:[#allocation0] sm:$0x1] %vm45_vm7, %v44_v25  }
  0x86   :  { %52 = vst.msk [vmem:[#allocation0] sm:$0x1] %vm51_vm8, %v50_v26  }
  0x87   :  { %58 = vst.msk [vmem:[#allocation0] sm:$0x1] %vm57_vm9, %v56_v18  }
  0x8c   :  { %v62_v27 = vpop.permute.xlu0 %61   ;;  %v68_v28 = vpop.permute.xlu1 %67  }
  0x8d   :  { %64 = vst.msk [vmem:[#allocation0] sm:$0x1] %vm63_vm10, %v62_v27  }
  0x8e   :  { %70 = vst.msk [vmem:[#allocation0] sm:$0x1] %vm69_vm11, %v68_v28  }
  0x8f   :  { %76 = vst.msk [vmem:[#allocation0] sm:$0x1] %vm75_vm12, %v74_v21  }
  0x94   :  { %v80_v29 = vpop.permute.xlu0 %79   ;;  %v86_v30 = vpop.permute.xlu1 %85  }
  0x95   :  { %82 = vst.msk [vmem:[#allocation0] sm:$0x1] %vm81_vm13, %v80_v29  }
  0x96   :  { %88 = vst.msk [vmem:[#allocation0] sm:$0x1] %vm87_vm14, %v86_v30  }
  0x97   :  { %94 = vst.msk [vmem:[#allocation0] sm:$0x1] %vm93_vm15, %v92_v24  }
  0x9e   :  { %v97_v31 = vld [vmem:[#allocation0] sm:$0x1] }
  0x9f   :  { %100 = vst [vmem:[%s208_s1] sm:$0x1] %v97_v31 }

</bundles_post_ra>
